<compile_context>
chip_gen: v6e
topology: v6e:2x2x1
jax: 0.10.0
libtpu: 0.0.40
codegen_flags: <defaults>
</compile_context>

<pallas_src>
import functools

import jax
import jax.numpy as jnp
from jax.experimental import pallas as pl
from jax.experimental.pallas import tpu as pltpu


def _round_up(x, m):
    return ((x + m - 1) // m) * m


def _dice_sums_kernel(x_ref, t_ref, out_ref, *, n_classes, tile_n, sub, hw,
                      tiles_per_split, apply_softmax, unroll):
    """Accumulate lane-partial intersect / z_sum / y_sum into out_ref.

    x_ref  : (C, tile_n)   scores for this hw tile, native dtype
    t_ref  : (1, tile_n)   int32 labels for this hw tile
    out_ref: (3, C, sub)   f32 lane-partial sums, resident across the k axis
    """
    s = pl.program_id(0)                         # core-split index
    k = pl.program_id(2)                         # hw tile within this split
    tile_idx = s * tiles_per_split + k           # global hw-tile index
    n_sub = tile_n // sub

    @pl.when(k == 0)
    def _():
        out_ref[...] = jnp.zeros_like(out_ref)

    cls_iota = jax.lax.broadcasted_iota(jnp.int32, (n_classes, sub), 0)

    def run(masked):
        lane_iota = jax.lax.broadcasted_iota(jnp.int32, (1, sub), 1)  # hoisted
        tile_base = tile_idx * tile_n

        def body(j, carry):
            pi, pz, py = carry
            off = pl.multiple_of(j * sub, sub)
            xs = x_ref[:, pl.ds(off, sub)].astype(jnp.float32)        # (C, sub)
            if apply_softmax:
                # softmax over the class (sublane) axis == torch.softmax(dim=1)
                xs = xs - jnp.max(xs, axis=0, keepdims=True)
                e = jnp.exp(xs)
                xs = e * pl.reciprocal(jnp.sum(e, axis=0, keepdims=True),
                                       approx=True)
            match = t_ref[:, pl.ds(off, sub)] == cls_iota             # (C, sub)
            if masked:
                valid = (tile_base + off + lane_iota) < hw            # (1, sub)
                match = match & valid
                xs = jnp.where(valid, xs, 0.0)   # mask AFTER softmax (NaN safe)
            pi = pi + jnp.where(match, xs, 0.0)                       # intersect
            pz = pz + xs * xs                                         # z_sum
            py = py + match.astype(jnp.float32)                       # y_sum
            return pi, pz, py

        zero = jnp.zeros((n_classes, sub), jnp.float32)
        pi, pz, py = jax.lax.fori_loop(0, n_sub, body, (zero, zero, zero),
                                       unroll=min(unroll, n_sub))
        out_ref[0] += pi
        out_ref[1] += pz
        out_ref[2] += py

    # Hot path: tiles fully inside [0, hw) need no lane masking at all.
    fully_valid = (tile_idx + 1) * tile_n <= hw

    @pl.when(fully_valid)
    def _():
        run(masked=False)

    @pl.when(jnp.logical_not(fully_valid))
    def _():
        run(masked=True)


def dice_loss(inputs, target, weight=None, softmax=False, *, tile_n=None):
    """Pallas port of DiceLoss.forward.

    inputs: [B, C, H, W] float scores (probabilities, or logits if softmax=True)
    target: [B, H, W]    integer labels in [0, C)
    """
    B, C, H, W = inputs.shape
    HW = H * W

    x = inputs.reshape(B, C, HW)                     # free reshape, native dtype
    t = target.reshape(B, 1, HW).astype(jnp.int32)

    # ---- lane layout --------------------------------------------------------
    # Inner sub-chunk: 512 lanes (4 f32 lane-vregs) when possible; fall back to
    # a 128-multiple (or the full HW) for tiny spatial sizes so block shapes
    # stay legal without padding the inputs in HBM.
    if HW >= 512:
        sub = 512
    elif HW >= 128:
        sub = (HW // 128) * 128
    else:
        sub = HW                                     # block == full lane dim

    # ---- generation-aware VMEM budget with layout-aware block sizes --------
    itemsize = jnp.dtype(inputs.dtype).itemsize
    sublane_pack = 8 * max(1, 4 // itemsize)         # 8 (f32), 16 (bf16), 32 (i8)
    c_pad_in = _round_up(C, sublane_pack)
    x_lane_bytes = c_pad_in * itemsize               # score block, per lane col
    t_lane_bytes = 8 * 4                             # int32 labels pad to 8 sublanes
    per_lane = x_lane_bytes + t_lane_bytes
    out_block_bytes = 3 * _round_up(C, 8) * sub * 4

    try:
        vmem_cap = int(pltpu.get_tpu_info().vmem_capacity_bytes)
    except Exception:                                # pragma: no cover
        vmem_cap = 64 * 1024 * 1024                  # conservative (v7x physical)
    # ~40 MiB usable on v7x (64 MiB physical), ~80 MiB on v5e/v6e (128 MiB).
    vmem_limit = (vmem_cap * 5) // 8

    headroom = 4 * 1024 * 1024                       # compiler scratch, vregs, ...
    io_budget = max(4 * 1024 * 1024,
                    vmem_limit - 2 * out_block_bytes - headroom)
    max_lanes = max(sub, ((io_budget // (2 * per_lane)) // sub) * sub)

    # Default tile targets ~4 MiB of HBM traffic per grid step so the ~0.35 us
    # per-step overhead is amortized (tn ~ 64k lanes for C=4 f32).
    if tile_n is None:
        tn = max(sub, ((4 * 1024 * 1024) // per_lane) // sub * sub)
    else:
        tn = max(sub, (int(tile_n) // sub) * sub)
    hw_cap = (HW // sub) * sub if HW >= sub else HW
    tn = min(tn, max_lanes, hw_cap)

    n_tiles = pl.cdiv(HW, tn)

    # ---- core split: keep both v7x TensorCores busy even when B == 1 -------
    n_splits = 2 if (B == 1 and n_tiles >= 2) else 1
    tiles_per_split = pl.cdiv(n_tiles, n_splits)

    def in_index(s, b, k):
        # Clamp virtual (past-the-end) tiles of the last split onto a valid
        # block; their contribution is fully masked out inside the kernel.
        tile = jnp.minimum(s * tiles_per_split + k, n_tiles - 1)
        return (b, 0, tile)

    kernel = functools.partial(
        _dice_sums_kernel, n_classes=C, tile_n=tn, sub=sub, hw=HW,
        tiles_per_split=tiles_per_split, apply_softmax=bool(softmax), unroll=4)

    partial_sums = pl.pallas_call(
        kernel,
        out_shape=jax.ShapeDtypeStruct((n_splits, B, 3, C, sub), jnp.float32),
        grid_spec=pltpu.PrefetchScalarGridSpec(
            num_scalar_prefetch=0,
            grid=(n_splits, B, tiles_per_split),
            in_specs=[
                pl.BlockSpec((None, C, tn), in_index),
                pl.BlockSpec((None, 1, tn), in_index),
            ],
            out_specs=pl.BlockSpec((None, None, 3, C, sub),
                                   lambda s, b, k: (s, b, 0, 0, 0)),
        ),
        compiler_params=pltpu.CompilerParams(
            dimension_semantics=("parallel", "parallel", "arbitrary"),
            vmem_limit_bytes=int(vmem_limit),
        ),
    )(x, t)

    # Tiny final combine in plain JAX: (S, B, 3, C, sub) -> (3, C)
    sums = jnp.sum(partial_sums, axis=(0, 1, 4))
    intersect, z_sum, y_sum = sums[0], sums[1], sums[2]

    smooth = 1e-5
    dice = 1.0 - (2.0 * intersect + smooth) / (z_sum + y_sum + smooth)

    if weight is None:
        weight = jnp.ones((C,), dtype=jnp.float32)
    else:
        weight = jnp.asarray(weight, dtype=jnp.float32)
    return jnp.sum(dice * weight) / C


def _reference_dice_loss(inputs, target, weight=None, softmax=False):
    """Pure-JAX reference mirroring the PyTorch module (for sanity check)."""
    B, C, H, W = inputs.shape
    if softmax:
        inputs = jax.nn.softmax(inputs, axis=1)
    onehot = (target[:, None, :, :]
              == jnp.arange(C)[None, :, None, None]).astype(jnp.float32)
    if weight is None:
        weight = [1.0] * C
    smooth = 1e-5
    loss = 0.0
    for i in range(C):
        s = inputs[:, i].astype(jnp.float32)
        tgt = onehot[:, i]
        intersect = jnp.sum(s * tgt)
        y = jnp.sum(tgt * tgt)
        z = jnp.sum(s * s)
        d = 1.0 - (2.0 * intersect + smooth) / (z + y + smooth)
        loss = loss + d * weight[i]
    return loss / C


if __name__ == "__main__":
    key = jax.random.PRNGKey(0)
    k1, k2, k3, k4 = jax.random.split(key, 4)

    # Case 1: module-default path (probabilities in, softmax=False), B=2, C=4.
    B, C, H, W = 2, 4, 16, 16
    logits = jax.random.normal(k1, (B, C, H, W), dtype=jnp.float32)
    scores = jax.nn.softmax(logits, axis=1)          # pseudo-probabilities
    target = jax.random.randint(k2, (B, H, W), 0, C, dtype=jnp.int32)

    loss = jax.block_until_ready(dice_loss(scores, target, softmax=False))
    ref = _reference_dice_loss(scores, target, softmax=False)
    assert jnp.allclose(loss, ref, rtol=1e-5, atol=1e-5), (loss, ref)

    # Case 2: softmax=True + per-class weights, B=1 (exercises the core-split
    # grid, multi-tile reduction and the masked ragged-tail path).
    B2, C2, H2, W2 = 1, 3, 48, 48
    logits2 = jax.random.normal(k3, (B2, C2, H2, W2), dtype=jnp.float32)
    target2 = jax.random.randint(k4, (B2, H2, W2), 0, C2, dtype=jnp.int32)
    w = [1.0, 2.0, 0.5]
    loss2 = jax.block_until_ready(
        dice_loss(logits2, target2, weight=w, softmax=True, tile_n=2048))
    ref2 = _reference_dice_loss(logits2, target2, weight=w, softmax=True)
    assert jnp.allclose(loss2, ref2, rtol=5e-3, atol=5e-3), (loss2, ref2)

    print("KERNEL_OK")
</pallas_src>

<mosaic_0001>
module attributes {stable_mosaic.version = 11 : i64} {
  func.func @_dice_sums_kernel(%arg0: i32, %arg1: i32, %arg2: i32, %arg3: memref<1x4x256xf32, #tpu.memory_space<vmem>>, %arg4: memref<1x1x256xi32, #tpu.memory_space<vmem>>, %arg5: memref<1x1x3x4x256xf32, #tpu.memory_space<vmem>>) attributes {dimension_semantics = [#tpu.dimension_semantics<parallel>, #tpu.dimension_semantics<parallel>, #tpu.dimension_semantics<arbitrary>], iteration_bounds = array<i64: 1, 2, 1>, scalar_prefetch = 0 : i64, scratch_operands = 0 : i64, tpu.core_type = #tpu.core_type<tc>, window_params = [{transform_indices = @transform_0, window_bounds = array<i64: 1, 4, 256>}, {transform_indices = @transform_1, window_bounds = array<i64: 1, 1, 256>}, {transform_indices = @transform_2, window_bounds = array<i64: 1, 1, 3, 4, 256>}]} {
    %c1_i32 = arith.constant 1 : i32
    %0 = arith.muli %arg0, %c1_i32 : i32
    %1 = arith.addi %0, %arg2 : i32
    %c0_i32 = arith.constant 0 : i32
    %2 = arith.cmpi eq, %arg2, %c0_i32 : i32
    %3 = arith.extui %2 : i1 to i32
    %c0_i32_0 = arith.constant 0 : i32
    %4 = arith.cmpi ne, %3, %c0_i32_0 : i32
    scf.if %4 {
      %cst = arith.constant 0.000000e+00 : f32
      %14 = vector.broadcast %cst : f32 to vector<3x4x256xf32>
      %c0 = arith.constant 0 : index
      %c0_5 = arith.constant 0 : index
      %c0_6 = arith.constant 0 : index
      %c0_7 = arith.constant 0 : index
      %c0_8 = arith.constant 0 : index
      %15 = vector.load %arg5[%c0, %c0_5, %c0_6, %c0_7, %c0_8] : memref<1x1x3x4x256xf32, #tpu.memory_space<vmem>>, vector<1x1x3x4x256xf32>
      %16 = vector.shape_cast %15 : vector<1x1x3x4x256xf32> to vector<3x4x256xf32>
      %17 = vector.shape_cast %14 : vector<3x4x256xf32> to vector<1x1x3x4x256xf32>
      tpu.vector_store %arg5[%c0, %c0_5, %c0_6, %c0_7, %c0_8], %17 {strides = array<i32>} : memref<1x1x3x4x256xf32, #tpu.memory_space<vmem>>, vector<1x1x3x4x256xf32>,
    } else {
    }
    %5 = tpu.iota {dimensions = array<i32: 0>} : vector<4x256xi32>
    %c1_i32_1 = arith.constant 1 : i32
    %6 = arith.addi %1, %c1_i32_1 : i32
    %c256_i32 = arith.constant 256 : i32
    %7 = arith.muli %6, %c256_i32 : i32
    %c256_i32_2 = arith.constant 256 : i32
    %8 = arith.cmpi sle, %7, %c256_i32_2 : i32
    %9 = arith.extui %8 : i1 to i32
    %c0_i32_3 = arith.constant 0 : i32
    %10 = arith.cmpi ne, %9, %c0_i32_3 : i32
    scf.if %10 {
      %cst = arith.constant 0.000000e+00 : f32
      %14 = vector.broadcast %cst : f32 to vector<4x256xf32>
      %c0_i32_5 = arith.constant 0 : i32
      %c256_i32_6 = arith.constant 256 : i32
      %15 = arith.muli %c0_i32_5, %c256_i32_6 : i32
      %16 = tpu.assume_multiple %15, 256 : i32
      %c0 = arith.constant 0 : index
      %c0_7 = arith.constant 0 : index
      %17 = arith.index_cast %16 : i32 to index
      %18 = vector.load %arg3[%c0, %c0_7, %17] : memref<1x4x256xf32, #tpu.memory_space<vmem>>, vector<1x4x256xf32>
      %19 = vector.shape_cast %18 : vector<1x4x256xf32> to vector<4x256xf32>
      %c0_8 = arith.constant 0 : index
      %c0_9 = arith.constant 0 : index
      %20 = arith.index_cast %16 : i32 to index
      %21 = vector.load %arg4[%c0_8, %c0_9, %20] : memref<1x1x256xi32, #tpu.memory_space<vmem>>, vector<1x1x256xi32>
      %22 = vector.shape_cast %21 : vector<1x1x256xi32> to vector<1x256xi32>
      %23 = vector.broadcast %22 : vector<1x256xi32> to vector<4x256xi32>
      %24 = arith.cmpi eq, %23, %5 : vector<4x256xi32>
      %cst_10 = arith.constant 0.000000e+00 : f32
      %25 = vector.broadcast %cst_10 : f32 to vector<4x256xf32>
      %26 = arith.select %24, %19, %25 : vector<4x256xi1>, vector<4x256xf32>
      %27 = arith.addf %14, %26 : vector<4x256xf32>
      %28 = arith.mulf %19, %19 : vector<4x256xf32>
      %29 = arith.addf %14, %28 : vector<4x256xf32>
      %30 = arith.extui %24 : vector<4x256xi1> to vector<4x256xi32>
      %31 = arith.sitofp %30 : vector<4x256xi32> to vector<4x256xf32>
      %32 = arith.addf %14, %31 : vector<4x256xf32>
      %c1_i32_11 = arith.constant 1 : i32
      %c0_12 = arith.constant 0 : index
      %c0_13 = arith.constant 0 : index
      %c0_14 = arith.constant 0 : index
      %c0_15 = arith.constant 0 : index
      %c0_16 = arith.constant 0 : index
      %33 = vector.load %arg5[%c0_12, %c0_13, %c0_14, %c0_15, %c0_16] : memref<1x1x3x4x256xf32, #tpu.memory_space<vmem>>, vector<1x1x1x4x256xf32>
      %34 = vector.shape_cast %33 : vector<1x1x1x4x256xf32> to vector<4x256xf32>
      %35 = arith.addf %34, %27 : vector<4x256xf32>
      %c0_17 = arith.constant 0 : index
      %c0_18 = arith.constant 0 : index
      %c0_19 = arith.constant 0 : index
      %c0_20 = arith.constant 0 : index
      %c0_21 = arith.constant 0 : index
      %36 = vector.load %arg5[%c0_17, %c0_18, %c0_19, %c0_20, %c0_21] : memref<1x1x3x4x256xf32, #tpu.memory_space<vmem>>, vector<1x1x1x4x256xf32>
      %37 = vector.shape_cast %36 : vector<1x1x1x4x256xf32> to vector<4x256xf32>
      %38 = vector.shape_cast %35 : vector<4x256xf32> to vector<1x1x1x4x256xf32>
      tpu.vector_store %arg5[%c0_17, %c0_18, %c0_19, %c0_20, %c0_21], %38 {strides = array<i32>} : memref<1x1x3x4x256xf32, #tpu.memory_space<vmem>>, vector<1x1x1x4x256xf32>,
      %c0_22 = arith.constant 0 : index
      %c0_23 = arith.constant 0 : index
      %c1 = arith.constant 1 : index
      %c0_24 = arith.constant 0 : index
      %c0_25 = arith.constant 0 : index
      %39 = vector.load %arg5[%c0_22, %c0_23, %c1, %c0_24, %c0_25] : memref<1x1x3x4x256xf32, #tpu.memory_space<vmem>>, vector<1x1x1x4x256xf32>
      %40 = vector.shape_cast %39 : vector<1x1x1x4x256xf32> to vector<4x256xf32>
      %41 = arith.addf %40, %29 : vector<4x256xf32>
      %c0_26 = arith.constant 0 : index
      %c0_27 = arith.constant 0 : index
      %c1_28 = arith.constant 1 : index
      %c0_29 = arith.constant 0 : index
      %c0_30 = arith.constant 0 : index
      %42 = vector.load %arg5[%c0_26, %c0_27, %c1_28, %c0_29, %c0_30] : memref<1x1x3x4x256xf32, #tpu.memory_space<vmem>>, vector<1x1x1x4x256xf32>
      %43 = vector.shape_cast %42 : vector<1x1x1x4x256xf32> to vector<4x256xf32>
      %44 = vector.shape_cast %41 : vector<4x256xf32> to vector<1x1x1x4x256xf32>
      tpu.vector_store %arg5[%c0_26, %c0_27, %c1_28, %c0_29, %c0_30], %44 {strides = array<i32>} : memref<1x1x3x4x256xf32, #tpu.memory_space<vmem>>, vector<1x1x1x4x256xf32>,
      %c0_31 = arith.constant 0 : index
      %c0_32 = arith.constant 0 : index
      %c2 = arith.constant 2 : index
      %c0_33 = arith.constant 0 : index
      %c0_34 = arith.constant 0 : index
      %45 = vector.load %arg5[%c0_31, %c0_32, %c2, %c0_33, %c0_34] : memref<1x1x3x4x256xf32, #tpu.memory_space<vmem>>, vector<1x1x1x4x256xf32>
      %46 = vector.shape_cast %45 : vector<1x1x1x4x256xf32> to vector<4x256xf32>
      %47 = arith.addf %46, %32 : vector<4x256xf32>
      %c0_35 = arith.constant 0 : index
      %c0_36 = arith.constant 0 : index
      %c2_37 = arith.constant 2 : index
      %c0_38 = arith.constant 0 : index
      %c0_39 = arith.constant 0 : index
      %48 = vector.load %arg5[%c0_35, %c0_36, %c2_37, %c0_38, %c0_39] : memref<1x1x3x4x256xf32, #tpu.memory_space<vmem>>, vector<1x1x1x4x256xf32>
      %49 = vector.shape_cast %48 : vector<1x1x1x4x256xf32> to vector<4x256xf32>
      %50 = vector.shape_cast %47 : vector<4x256xf32> to vector<1x1x1x4x256xf32>
      tpu.vector_store %arg5[%c0_35, %c0_36, %c2_37, %c0_38, %c0_39], %50 {strides = array<i32>} : memref<1x1x3x4x256xf32, #tpu.memory_space<vmem>>, vector<1x1x1x4x256xf32>,
    } else {
    }
    %true = arith.constant true
    %11 = arith.xori %8, %true : i1
    %12 = arith.extui %11 : i1 to i32
    %c0_i32_4 = arith.constant 0 : i32
    %13 = arith.cmpi ne, %12, %c0_i32_4 : i32
    scf.if %13 {
      %14 = tpu.iota {dimensions = array<i32: 1>} : vector<1x256xi32>
      %c256_i32_5 = arith.constant 256 : i32
      %15 = arith.muli %1, %c256_i32_5 : i32
      %cst = arith.constant 0.000000e+00 : f32
      %16 = vector.broadcast %cst : f32 to vector<4x256xf32>
      %c0_i32_6 = arith.constant 0 : i32
      %c256_i32_7 = arith.constant 256 : i32
      %17 = arith.muli %c0_i32_6, %c256_i32_7 : i32
      %18 = tpu.assume_multiple %17, 256 : i32
      %c0 = arith.constant 0 : index
      %c0_8 = arith.constant 0 : index
      %19 = arith.index_cast %18 : i32 to index
      %20 = vector.load %arg3[%c0, %c0_8, %19] : memref<1x4x256xf32, #tpu.memory_space<vmem>>, vector<1x4x256xf32>
      %21 = vector.shape_cast %20 : vector<1x4x256xf32> to vector<4x256xf32>
      %c0_9 = arith.constant 0 : index
      %c0_10 = arith.constant 0 : index
      %22 = arith.index_cast %18 : i32 to index
      %23 = vector.load %arg4[%c0_9, %c0_10, %22] : memref<1x1x256xi32, #tpu.memory_space<vmem>>, vector<1x1x256xi32>
      %24 = vector.shape_cast %23 : vector<1x1x256xi32> to vector<1x256xi32>
      %25 = vector.broadcast %24 : vector<1x256xi32> to vector<4x256xi32>
      %26 = arith.cmpi eq, %25, %5 : vector<4x256xi32>
      %27 = arith.addi %15, %18 : i32
      %28 = vector.broadcast %27 : i32 to vector<1x256xi32>
      %29 = arith.addi %28, %14 : vector<1x256xi32>
      %c256_i32_11 = arith.constant 256 : i32
      %30 = vector.broadcast %c256_i32_11 : i32 to vector<1x256xi32>
      %31 = arith.cmpi slt, %29, %30 : vector<1x256xi32>
      %32 = vector.broadcast %31 : vector<1x256xi1> to vector<4x256xi1>
      %33 = arith.andi %26, %32 : vector<4x256xi1>
      %cst_12 = arith.constant 0.000000e+00 : f32
      %34 = vector.shape_cast %31 : vector<1x256xi1> to vector<1x256xi1>
      %35 = vector.broadcast %34 : vector<1x256xi1> to vector<4x256xi1>
      %36 = vector.broadcast %cst_12 : f32 to vector<4x256xf32>
      %37 = arith.select %35, %21, %36 : vector<4x256xi1>, vector<4x256xf32>
      %cst_13 = arith.constant 0.000000e+00 : f32
      %38 = vector.broadcast %cst_13 : f32 to vector<4x256xf32>
      %39 = arith.select %33, %37, %38 : vector<4x256xi1>, vector<4x256xf32>
      %40 = arith.addf %16, %39 : vector<4x256xf32>
      %41 = arith.mulf %37, %37 : vector<4x256xf32>
      %42 = arith.addf %16, %41 : vector<4x256xf32>
      %43 = arith.extui %33 : vector<4x256xi1> to vector<4x256xi32>
      %44 = arith.sitofp %43 : vector<4x256xi32> to vector<4x256xf32>
      %45 = arith.addf %16, %44 : vector<4x256xf32>
      %c1_i32_14 = arith.constant 1 : i32
      %c0_15 = arith.constant 0 : index
      %c0_16 = arith.constant 0 : index
      %c0_17 = arith.constant 0 : index
      %c0_18 = arith.constant 0 : index
      %c0_19 = arith.constant 0 : index
      %46 = vector.load %arg5[%c0_15, %c0_16, %c0_17, %c0_18, %c0_19] : memref<1x1x3x4x256xf32, #tpu.memory_space<vmem>>, vector<1x1x1x4x256xf32>
      %47 = vector.shape_cast %46 : vector<1x1x1x4x256xf32> to vector<4x256xf32>
      %48 = arith.addf %47, %40 : vector<4x256xf32>
      %c0_20 = arith.constant 0 : index
      %c0_21 = arith.constant 0 : index
      %c0_22 = arith.constant 0 : index
      %c0_23 = arith.constant 0 : index
      %c0_24 = arith.constant 0 : index
      %49 = vector.load %arg5[%c0_20, %c0_21, %c0_22, %c0_23, %c0_24] : memref<1x1x3x4x256xf32, #tpu.memory_space<vmem>>, vector<1x1x1x4x256xf32>
      %50 = vector.shape_cast %49 : vector<1x1x1x4x256xf32> to vector<4x256xf32>
      %51 = vector.shape_cast %48 : vector<4x256xf32> to vector<1x1x1x4x256xf32>
      tpu.vector_store %arg5[%c0_20, %c0_21, %c0_22, %c0_23, %c0_24], %51 {strides = array<i32>} : memref<1x1x3x4x256xf32, #tpu.memory_space<vmem>>, vector<1x1x1x4x256xf32>,
      %c0_25 = arith.constant 0 : index
      %c0_26 = arith.constant 0 : index
      %c1 = arith.constant 1 : index
      %c0_27 = arith.constant 0 : index
      %c0_28 = arith.constant 0 : index
      %52 = vector.load %arg5[%c0_25, %c0_26, %c1, %c0_27, %c0_28] : memref<1x1x3x4x256xf32, #tpu.memory_space<vmem>>, vector<1x1x1x4x256xf32>
      %53 = vector.shape_cast %52 : vector<1x1x1x4x256xf32> to vector<4x256xf32>
      %54 = arith.addf %53, %42 : vector<4x256xf32>
      %c0_29 = arith.constant 0 : index
      %c0_30 = arith.constant 0 : index
      %c1_31 = arith.constant 1 : index
      %c0_32 = arith.constant 0 : index
      %c0_33 = arith.constant 0 : index
      %55 = vector.load %arg5[%c0_29, %c0_30, %c1_31, %c0_32, %c0_33] : memref<1x1x3x4x256xf32, #tpu.memory_space<vmem>>, vector<1x1x1x4x256xf32>
      %56 = vector.shape_cast %55 : vector<1x1x1x4x256xf32> to vector<4x256xf32>
      %57 = vector.shape_cast %54 : vector<4x256xf32> to vector<1x1x1x4x256xf32>
      tpu.vector_store %arg5[%c0_29, %c0_30, %c1_31, %c0_32, %c0_33], %57 {strides = array<i32>} : memref<1x1x3x4x256xf32, #tpu.memory_space<vmem>>, vector<1x1x1x4x256xf32>,
      %c0_34 = arith.constant 0 : index
      %c0_35 = arith.constant 0 : index
      %c2 = arith.constant 2 : index
      %c0_36 = arith.constant 0 : index
      %c0_37 = arith.constant 0 : index
      %58 = vector.load %arg5[%c0_34, %c0_35, %c2, %c0_36, %c0_37] : memref<1x1x3x4x256xf32, #tpu.memory_space<vmem>>, vector<1x1x1x4x256xf32>
      %59 = vector.shape_cast %58 : vector<1x1x1x4x256xf32> to vector<4x256xf32>
      %60 = arith.addf %59, %45 : vector<4x256xf32>
      %c0_38 = arith.constant 0 : index
      %c0_39 = arith.constant 0 : index
      %c2_40 = arith.constant 2 : index
      %c0_41 = arith.constant 0 : index
      %c0_42 = arith.constant 0 : index
      %61 = vector.load %arg5[%c0_38, %c0_39, %c2_40, %c0_41, %c0_42] : memref<1x1x3x4x256xf32, #tpu.memory_space<vmem>>, vector<1x1x1x4x256xf32>
      %62 = vector.shape_cast %61 : vector<1x1x1x4x256xf32> to vector<4x256xf32>
      %63 = vector.shape_cast %60 : vector<4x256xf32> to vector<1x1x1x4x256xf32>
      tpu.vector_store %arg5[%c0_38, %c0_39, %c2_40, %c0_41, %c0_42], %63 {strides = array<i32>} : memref<1x1x3x4x256xf32, #tpu.memory_space<vmem>>, vector<1x1x1x4x256xf32>,
    } else {
    }
    return
  }
  func.func @transform_0(%arg0: i32, %arg1: i32, %arg2: i32) -> (i32, i32, i32) {
    %c1_i32 = arith.constant 1 : i32
    %0 = arith.muli %arg0, %c1_i32 : i32
    %1 = arith.addi %0, %arg2 : i32
    %c0_i32 = arith.constant 0 : i32
    %2 = arith.minsi %1, %c0_i32 : i32
    %c0_i32_0 = arith.constant 0 : i32
    %c0_i32_1 = arith.constant 0 : i32
    return %arg1, %c0_i32_0, %2 : i32, i32, i32
  }
  func.func @transform_1(%arg0: i32, %arg1: i32, %arg2: i32) -> (i32, i32, i32) {
    %c1_i32 = arith.constant 1 : i32
    %0 = arith.muli %arg0, %c1_i32 : i32
    %1 = arith.addi %0, %arg2 : i32
    %c0_i32 = arith.constant 0 : i32
    %2 = arith.minsi %1, %c0_i32 : i32
    %c0_i32_0 = arith.constant 0 : i32
    %c0_i32_1 = arith.constant 0 : i32
    return %arg1, %c0_i32_0, %2 : i32, i32, i32
  }
  func.func @transform_2(%arg0: i32, %arg1: i32, %arg2: i32) -> (i32, i32, i32, i32, i32) {
    %c0_i32 = arith.constant 0 : i32
    %c0_i32_0 = arith.constant 0 : i32
    %c0_i32_1 = arith.constant 0 : i32
    %c0_i32_2 = arith.constant 0 : i32
    return %arg0, %arg1, %c0_i32, %c0_i32_0, %c0_i32_1 : i32, i32, i32, i32, i32
  }
}

</mosaic_0001>

<bundles_post_ra>
// kernel: tpu_custom_call.1
= control target key start
LH: loop header
LB: loop body
LE: loop exit
PB: predicated region body
PF: predicated region fallthrough
CT: control target
= control target key end

     0   :  { %7 = vsyncpa [#allocation3], 0  ;;  %s966_s0 = inlined_call_operand.hbm [shape: f32[2,4,256], index: 0, kind: input, shape index: {}]   ;;  %s967_s1 = inlined_call_operand.hbm [shape: s32[2,1,256], index: 1, kind: input, shape index: {}]   ;;  %s968_s2 = inlined_call_operand.hbm [shape: f32[1,2,3,4,256], index: 2, kind: output, shape index: {}]  }
   0x1   :  { %9 = vsyncpa [#allocation3 + $0x1], 0 }
   0x2   :  { %10 = vsyncpa [#allocation6], 0 }
   0x3   :  { %12 = vsyncpa [#allocation6 + $0x1], 0 }
   0x4   :  { %13 = vsyncpa [#allocation4], 0 }
   0x5   :  { %15 = vsyncpa [#allocation4 + $0x1], 0  ;;  %s787_s9 = smov 0   ;;  %s789_s10 = smov 0  }
   0x6   :  { %s791_s11 = smov 0   ;;  %s793_s12 = smov 0  }
   0x7   :  { %s795_s13 = smov 0   ;;  %s797_s14 = smov 0  }
   0x8 LB: > { %s521_s15 = sadd.s32 4294967295, %s764_s14   ;;  %s522_s16 = sadd.s32 4294967294, %s764_s14   ;;  %s764_s14 = sphi %s797_s14, %s21_s14   ;;  %s760_s13 = sphi %s795_s13, %s980_s13   ;;  %s756_s12 = sphi %s793_s12, %s979_s12   ;;  %s752_s11 = sphi %s791_s11, %s978_s11   ;;  %s748_s10 = sphi %s789_s10, %s977_s10   ;;  %s744_s9 = sphi %s787_s9, %s976_s9  }
   0x9   : > { %s36_s17 = sadd.s32 1, %s760_s13  ;;  %s55_s18 = sadd.s32 1, %s752_s11 }
   0xa   : > { %p38_p0 = scmp.ge.s32.totalorder %s36_s17, 2  ;;  %p62_p1 = scmp.ne.s32.totalorder %s752_s11, %s748_s10 }
   0xb   : > { %p63_p2 = scmp.eq.s32.totalorder %s764_s14, 0  ;;  %p68_p3 = scmp.ne.s32.totalorder %s748_s10, %s744_s9 }
   0xc   : > { %s982_s17 = smov (%p38_p0, %s36_s17), 0  ;;  %p69_p5 = scmp.eq.s32.totalorder %s521_s15, 0 }
   0xd   : > { %p828_p4 = por %p63_p2, %p62_p1  ;;  %s50_s20 = ssub.s32 %s760_s13, %s982_s17 }
   0xe   : > { %p128_p6 = scmp.eq.s32.totalorder %s521_s15, 1  ;;  %p53_p7 = scmp.eq.s32.totalorder %s50_s20, 0 }
   0xf   : > { %p834_p8 = por %p69_p5, %p68_p3  ;;  %p134_p10 = scmp.eq.s32.totalorder %s522_s16, 1 }
  0x10   : > { %p838_p9 = por %p128_p6, %p62_p1  ;;  %p570_p13 = scmp.lt.s32.totalorder %s764_s14, 2 }
  0x11   : > { %s843_s23 = scalar_select %p53_p7, %s752_s11, %s55_s18  }
  0x12   : > { %p845_p11 = por %p134_p10, %p68_p3  ;;  %s852_s25 = sand.u32 1, %s752_s11  }
  0x13   : > { %s525_s26 = sshll.u32 %s852_s25, 3  ;;  %s549_s27 = sshll.u32 %s760_s13, 7 }
  0x14   : > { %s169_s30 = scalar_lea.hbm %s966_s0, %s549_s27  ;;  %s158_s3 = scalar_lea.vmem [#allocation2], %s525_s26 }
  0x15   : > { %s171_s4 = sshll.u32 %s158_s3, 4  ;;  %p861_p0 = pnand %p570_p13, %p828_p4  ;;  %s172_s4 = int_to_ptr.vmem [resolvable:$true] %s171_s4 }
  0x16   : > { %p531_p1 = scmp.ge.s32.totalorder %s764_s14, 1  ;;  %p200_p2 = scmp.lt.s32.totalorder %s764_s14, 3 }
  0x17   : > { %s155_s6 = scalar_lea.sflag [#allocation3], %s852_s25  ;;  %p626_p3 = pneg %p861_p0 }
  0x18   : > { %s637_s7 = scalar_lea.vmem %s172_s4, 128  ;;  %s766_s8 = smov [#allocation2]  }
  0x19   : > { %p638_p5 = scmp.ne.s32.totalorder %s172_s4, %s637_s7  ;;  %s642_s15 = sshll.u32 %s766_s8, 4  ;;  %s643_s15 = int_to_ptr.vmem [resolvable:$false] %s642_s15 }
  0x1a   : > { %s644_s16 = scalar_lea.vmem %s643_s15, 256  ;;  %p645_p4 = scmp.lt.s32.totalorder %s172_s4, %s643_s15 }
  0x1b   : > { %p640_p6 = pnand %p638_p5, %p626_p3  ;;  %p646_p10 = scmp.lt.s32.totalorder %s644_s16, %s637_s7 }
  0x1d   : > { %p641_p7 = pneg %p640_p6  ;;  %p647_p13 = por %p646_p10, %p645_p4 }
  0x1f   : > { %p648_p12 = pnand %p647_p13, %p641_p7 }
  0x21   : > { %651 = shalt.err (!%p648_p12)
}
  0x22   : > { %562 = dma.hbm_to_vmem [thread:$0]  (!%p861_p0), %s169_s30, 128, %s172_s4, %s155_s6  }
  0x23   : > { %p879_p5 = pnand %p531_p1, %p200_p2  ;;  %s528_s19 = sshll.u32 %s852_s25, 1 }
  0x24   : > { %s550_s20 = sshll.u32 %s760_s13, 5  ;;  %s182_s29 = scalar_lea.vmem [#allocation5], %s528_s19 }
  0x25   : > { %s193_s28 = scalar_lea.hbm %s967_s1, %s550_s20  ;;  %s195_s3 = sshll.u32 %s182_s29, 4  ;;  %s196_s3 = int_to_ptr.vmem [resolvable:$true] %s195_s3 }
  0x26   : > { %s179_s7 = scalar_lea.sflag [#allocation6], %s852_s25  ;;  %s665_s8 = scalar_lea.vmem %s196_s3, 32 }
  0x27   : > { %p666_p12 = scmp.ne.s32.totalorder %s196_s3, %s665_s8  ;;  %s767_s30 = smov [#allocation5]  }
  0x28   : > { %s670_s4 = sshll.u32 %s767_s30, 4  ;;  %s671_s4 = int_to_ptr.vmem [resolvable:$false] %s670_s4 }
  0x29   : > { %p668_p6 = pnand %p666_p12, %p626_p3  ;;  %s672_s6 = scalar_lea.vmem %s671_s4, 64 }
  0x2a   : > { %p673_p1 = scmp.lt.s32.totalorder %s196_s3, %s671_s4  ;;  %p674_p2 = scmp.lt.s32.totalorder %s672_s6, %s665_s8 }
  0x2b   : > { %p669_p7 = pneg %p668_p6 }
  0x2c   : > { %p675_p4 = por %p674_p2, %p673_p1 }
  0x2e   : > { %p676_p10 = pnand %p675_p4, %p669_p7 }
  0x30   : > { %679 = shalt.err (!%p676_p10)
}
  0x31   : > { %565 = dma.hbm_to_vmem [thread:$0]  (!%p861_p0), %s193_s28, 32, %s196_s3, %s179_s7  }
  0x32   : > { %204 = sbr.rel (%p879_p5) target bundleno = 85 (0x55), region = 28  ;;  %s897_s25 = sand.u32 (!%p879_p5), 1, %s748_s10  }
  0x33   : > { %s532_s15 = sshll.u32 (!%p879_p5), %s897_s25, 3  ;;  %s207_s16 = scalar_lea.sflag (!%p879_p5), [#allocation3], %s897_s25 }
  0x34   : > { %s210_s19 = scalar_lea.vmem (!%p879_p5), [#allocation2], %s532_s15 }
  0x37   : > { %731 = dma.done.wait (%p834_p8), %s207_s16, 128  }
  0x38   : > { %733 = vsyncadd (%p834_p8), %s207_s16, 4294967168  ;;  %s533_s5 = sshll.u32 %s897_s25, 1  ;;  %s216_s18 = scalar_lea.sflag [#allocation6], %s897_s25 }
  0x39   : > { %s219_s20 = scalar_lea.vmem [#allocation5], %s533_s5 }
  0x3a   : > { %735 = dma.done.wait (%p834_p8), %s216_s18, 32  }
  0x3b   : > { %737 = vsyncadd (%p834_p8), %s216_s18, 4294967264  ;;  %v261_v0 = vlaneseq  ;;  %s551_s26 = smul.u32 24, %s897_s25  ;;  %v269_v4 = vld [vmem:[%s210_s19] sm:$0xff]  ;;  %v270_v5 = vld [vmem:[%s219_s20] sm:$0x3]  ;;  %v768_v12 = vmov 0.0  }
  0x3c   : > { %v282_v8 = vcombine.high %v269_v4, %v269_v4  ;;  %v288_v9 = vmul.f32 %v269_v4, %v269_v4  ;;  %s552_s27 = smul.u32 384, %s756_s12  ;;  %s390_s12 = scalar_lea.sflag [#allocation4], %s897_s25 }
  0x3d   : > { %v262_v1 = vshrl.u32 %v261_v0, 7  ;;  %s244_s21 = scalar_lea.vmem [#allocation7], %s551_s26  ;;  %s769_s30 = smov [#allocation7]  }
  0x3e   : > { %s405_s28 = sshll.u32 %s244_s21, 4  ;;  %537 = vst [vmem:[%s244_s21 + $0x8] sm:$0xff] %v288_v9  ;;  %s916_s7 = scalar_lea.hbm %s968_s2, %s552_s27  ;;  %s918_s28 = int_to_ptr.vmem [resolvable:$true] %s405_s28 }
  0x3f   : > { %v273_v2 = vsub.s32 0, %v262_v1  ;;  %v277_v3 = vsub.s32 1, %v262_v1  ;;  %s680_s8 = scalar_lea.vmem %s918_s28, 384  ;;  %s684_s4 = sshll.u32 %s769_s30, 4  ;;  %s685_s4 = int_to_ptr.vmem [resolvable:$false] %s684_s4 }
  0x40   : > { %p681_p8 = scmp.ne.s32.totalorder %s918_s28, %s680_s8  ;;  %s686_s6 = scalar_lea.vmem %s685_s4, 768 }
  0x41   : > { %v274_v6 = vrot.slane %v270_v5, %v273_v2  ;;  %v278_v7 = vrot.slane %v270_v5, %v277_v3  ;;  %p687_p13 = scmp.lt.s32.totalorder %s918_s28, %s685_s4  ;;  %p688_p5 = scmp.lt.s32.totalorder %s686_s6, %s680_s8 }
  0x42   : > { %p682_p0 = pnand %p681_p8, %p838_p9 }
  0x43   : > { %vm279_vm0 = vcmp.eq.s32.totalorder %v274_v6, %v262_v1  ;;  %vm280_vm1 = vcmp.eq.s32.totalorder %v278_v7, %v262_v1  ;;  %p689_p12 = por %p688_p5, %p687_p13 }
  0x44   : > { %v284_v10 = vsel %vm279_vm0, %v269_v4, 0.0  ;;  %v285_v11 = vsel %vm280_vm1, %v282_v8, 0.0  ;;  %v534_v13 = vsel %vm279_vm0, 1.0, %v768_v12  ;;  %v535_v14 = vsel %vm280_vm1, 1.0, %v768_v12  ;;  %p683_p3 = pneg %p682_p0 }
  0x45   : > { %v299_v15 = vcombine.low %v284_v10, %v285_v11  ;;  %v311_v16 = vcombine.low %v534_v13, %v535_v14 }
  0x46   : > { %p690_p6 = pnand %p689_p12, %p683_p3 }
  0x47   : > { %302 = vst [vmem:[%s244_s21] sm:$0xff] %v299_v15  ;;  %539 = vst [vmem:[%s244_s21 + $0x10] sm:$0xff] %v311_v16 }
  0x48   : > { %693 = shalt.err (!%p690_p6)
}
  0x49   : > { %s694_s15 = scalar_lea.hbm %s916_s7, 384  ;;  %s698_s5 = scalar_lea.hbm %s968_s2, 768 }
  0x4a   : > { %p695_p7 = scmp.ne.s32.totalorder %s916_s7, %s694_s15  ;;  %p699_p4 = scmp.lt.s32.totalorder %s916_s7, %s968_s2 }
  0x4b   : > { %p700_p10 = scmp.lt.s32.totalorder %s698_s5, %s694_s15 }
  0x4c   : > { %p696_p1 = pnand %p695_p7, %p838_p9 }
  0x4d   : > { %p701_p8 = por %p700_p10, %p699_p4 }
  0x4e   : > { %p697_p2 = pneg %p696_p1 }
  0x50   : > { %p702_p0 = pnand %p701_p8, %p697_p2 }
  0x52   : > { %705 = shalt.err (!%p702_p0)
}
  0x53   : > { %s770_s26 = smov 128   ;;  %s771_s27 = smov 8  }
  0x54   : > { %557 = dma.vmem_to_hbm [thread:$0]  (%p838_p9), %s918_s28, 384, %s916_s7, %s390_s12, %s770_s26, %s770_s26, %s771_s27  }
  0x55 PF: > { %s420_s21 = sand.u32 1, %s744_s9   ;;  %p975_p3 = scmp.ge.s32.totalorder %s764_s14, 2 }
  0x56   : > { %s421_s29 = scalar_lea.sflag [#allocation4], %s420_s21 }
  0x57   : > { %p567_p13 = pnand %p975_p3, %p845_p11 }
  0x59   : > { %p568_p5 = pneg %p567_p13 }
  0x5b   : > { %739 = dma.done.wait (%p568_p5), %s421_s29, 384  }
  0x5c   : > { %741 = vsyncadd (%p568_p5), %s421_s29, 4294966912  ;;  %s21_s14 = sadd.s32 1, %s764_s14   ;;  %s976_s9 = smov %s748_s10 }
  0x5d   : > { %p18_p12 = scmp.ge.s32.totalorder %s21_s14, 4   ;;  %s977_s10 = smov %s752_s11 }
  0x5e   : > { %s978_s11 = smov %s843_s23  ;;  %s979_s12 = smov %s760_s13 }
  0x5f   : > { %s980_s13 = smov %s982_s17  ;;  %20 = sbr.rel (!%p18_p12) target bundleno = 8 (0x8), region = 102 }
  0x64   :  { %426 = vsyncpa [#allocation3], 1 }
  0x65   :  { %428 = vsyncpa [#allocation3 + $0x1], 1 }
  0x66   :  { %429 = vsyncpa [#allocation6], 1 }
  0x67   :  { %431 = vsyncpa [#allocation6 + $0x1], 1 }
  0x68   :  { %432 = vsyncpa [#allocation4], 1 }
  0x69   :  { %434 = vsyncpa [#allocation4 + $0x1], 1 }

</bundles_post_ra>
